<compile_context>
chip_gen: v5e
topology: v5e:2x2
jax: 0.10.0
libtpu: 0.0.40
codegen_flags: <defaults>
</compile_context>

<pallas_src>
import functools
import math

import jax
import jax.numpy as jnp
from jax.experimental import pallas as pl
from jax.experimental.pallas import tpu as pltpu


def _mhsa_kernel(x_ref, kpm_ref, am_ref,
                 gamma_ref, beta_ref,
                 wqkv_t_ref, bqkv_ref, wo_t_ref, bo_ref,
                 out_ref, cache_ref,
                 *, num_heads, eps):
    # One grid step == one batch element.
    x = x_ref[0]                                    # (T, D) f32
    T, D = x.shape
    H = num_heads
    dh = D // H

    # ---- LayerNorm over last dim (f32) ----
    mean = jnp.mean(x, axis=-1, keepdims=True)
    var = jnp.mean(jnp.square(x - mean), axis=-1, keepdims=True)
    xn = (x - mean) * jax.lax.rsqrt(var + eps)
    xn = xn * gamma_ref[...] + beta_ref[...]        # (T, D) f32

    cache_ref[0] = xn.astype(cache_ref.dtype)

    # ---- fused QKV in-projection: one bf16 MXU matmul, f32 accumulation ----
    # wqkv_t is pre-transposed to (D, 3D) on the host; the 1/sqrt(dh) query scale is
    # already folded into the Wq columns and bq entries.
    xn_b = xn.astype(jnp.bfloat16)
    qkv = jnp.dot(xn_b, wqkv_t_ref[...],
                  preferred_element_type=jnp.float32) + bqkv_ref[...]   # (T, 3D) f32
    qkv_b = qkv.astype(jnp.bfloat16)

    # Head-batched (H, T, dh) layout for batched MXU dots (no per-head lane slicing).
    qh = jnp.swapaxes(qkv_b[:, 0 * D:1 * D].reshape(T, H, dh), 0, 1)    # (H, T, dh)
    kh = jnp.swapaxes(qkv_b[:, 1 * D:2 * D].reshape(T, H, dh), 0, 1)
    vh = jnp.swapaxes(qkv_b[:, 2 * D:3 * D].reshape(T, H, dh), 0, 1)

    # ---- additive mask bias, computed once per grid step (finite => no NaN rows) ----
    kpm = kpm_ref[0]                                 # (1, T) int32, nonzero = valid key
    am = am_ref[...]                                 # (T, T) int32, nonzero = allowed
    allowed = (am != 0) & (kpm != 0)                 # (T, T)
    bias = jnp.where(allowed, jnp.float32(0.0), jnp.float32(-1e30))     # (T, T) f32

    # ---- head-batched attention, softmax in f32, deferred normalization ----
    s = jnp.einsum('hqd,hkd->hqk', qh, kh,
                   preferred_element_type=jnp.float32)                  # (H, T, T) f32
    s = s + bias[None, :, :]
    m = jnp.max(s, axis=-1, keepdims=True)
    p = jnp.exp(s - m)                                                  # unnormalized
    l = jnp.sum(p, axis=-1, keepdims=True)                              # (H, T, 1)
    o = jnp.einsum('hqk,hkd->hqd', p.astype(jnp.bfloat16), vh,
                   preferred_element_type=jnp.float32)                  # (H, T, dh)
    o = o * pl.reciprocal(l, approx=True)            # deferred softmax normalization
    o_b = o.astype(jnp.bfloat16)

    # ---- output projection: per-head accumulation (sublane-aligned wo_t slices),
    #      no lane-dim concatenate ----
    acc = jnp.dot(o_b[0], wo_t_ref[0:dh, :], preferred_element_type=jnp.float32)
    for h in range(1, H):
        acc = acc + jnp.dot(o_b[h], wo_t_ref[h * dh:(h + 1) * dh, :],
                            preferred_element_type=jnp.float32)
    out = acc + bo_ref[...]
    out_ref[0] = out.astype(out_ref.dtype)


def transformer_mhsa_forward(x, key_padding_mask, attn_mask, params,
                             *, num_heads, batch_first=True, eps=1e-5):
    """Pallas implementation of TransformerMHSA.forward (cache=None path).

    x:                (B, T, D) if batch_first else (T, B, D), float32
    key_padding_mask: (B, T)  -- True/nonzero means 'valid'
    attn_mask:        (T, T)  -- True/nonzero means 'allowed'
    returns (output, cache) in the same layout as the input.
    """
    if not batch_first:
        x = jnp.transpose(x, (1, 0, 2))
    B, T, D = x.shape
    assert D % num_heads == 0
    dh = D // num_heads
    scale = 1.0 / math.sqrt(dh)

    gamma, beta, wqkv, bqkv, wo, bo = params
    gamma = gamma.reshape(1, D).astype(jnp.float32)
    beta = beta.reshape(1, D).astype(jnp.float32)

    # Host-side weight prep (done once, outside the kernel):
    #  - fold the 1/sqrt(dh) query scale into Wq / bq
    #  - pre-transpose in/out projection weights so the kernel never transposes
    #  - cast matmul weights to bf16 (biases stay f32, added post-accumulation)
    row_scale = jnp.concatenate([
        jnp.full((D,), scale, jnp.float32),
        jnp.ones((2 * D,), jnp.float32)])
    wqkv_t = (wqkv.astype(jnp.float32) * row_scale[:, None]).T.astype(jnp.bfloat16)  # (D, 3D)
    bqkv_r = (bqkv.astype(jnp.float32) * row_scale).reshape(1, 3 * D)                # (1, 3D) f32
    wo_t = wo.astype(jnp.float32).T.astype(jnp.bfloat16)                             # (D, D)
    bo_r = bo.reshape(1, D).astype(jnp.float32)

    kpm = key_padding_mask.astype(jnp.int32).reshape(B, 1, T)
    am = attn_mask.astype(jnp.int32)

    act_spec = pl.BlockSpec((1, T, D), lambda b: (b, 0, 0))
    kernel = functools.partial(_mhsa_kernel, num_heads=num_heads, eps=eps)

    out, cache = pl.pallas_call(
        kernel,
        out_shape=(jax.ShapeDtypeStruct((B, T, D), x.dtype),
                   jax.ShapeDtypeStruct((B, T, D), x.dtype)),
        grid_spec=pltpu.PrefetchScalarGridSpec(
            num_scalar_prefetch=0,
            grid=(B,),
            in_specs=[
                act_spec,                                        # x
                pl.BlockSpec((1, 1, T), lambda b: (b, 0, 0)),    # key_padding_mask
                pl.BlockSpec((T, T), lambda b: (0, 0)),          # attn_mask
                pl.BlockSpec((1, D), lambda b: (0, 0)),          # ln gamma
                pl.BlockSpec((1, D), lambda b: (0, 0)),          # ln beta
                pl.BlockSpec((D, 3 * D), lambda b: (0, 0)),      # in_proj weight^T (bf16, scaled)
                pl.BlockSpec((1, 3 * D), lambda b: (0, 0)),      # in_proj bias (scaled)
                pl.BlockSpec((D, D), lambda b: (0, 0)),          # out_proj weight^T (bf16)
                pl.BlockSpec((1, D), lambda b: (0, 0)),          # out_proj bias
            ],
            out_specs=(act_spec, act_spec),
        ),
        compiler_params=pltpu.CompilerParams(
            dimension_semantics=("parallel",)),
    )(x, kpm, am, gamma, beta, wqkv_t, bqkv_r, wo_t, bo_r)

    if not batch_first:
        out = jnp.transpose(out, (1, 0, 2))
        cache = jnp.transpose(cache, (1, 0, 2))
    return out, cache


def _reference_forward(x, key_padding_mask, attn_mask, params, *, num_heads, eps=1e-5):
    """Pure-JAX f32 reference matching nn.LayerNorm + nn.MultiheadAttention (eval)."""
    gamma, beta, wqkv, bqkv, wo, bo = params
    B, T, D = x.shape
    H = num_heads
    dh = D // H

    mean = x.mean(-1, keepdims=True)
    var = ((x - mean) ** 2).mean(-1, keepdims=True)
    xn = (x - mean) / jnp.sqrt(var + eps) * gamma + beta

    q = xn @ wqkv[:D].T + bqkv[:D]
    k = xn @ wqkv[D:2 * D].T + bqkv[D:2 * D]
    v = xn @ wqkv[2 * D:].T + bqkv[2 * D:]

    qh = q.reshape(B, T, H, dh).transpose(0, 2, 1, 3) / math.sqrt(dh)
    kh = k.reshape(B, T, H, dh).transpose(0, 2, 1, 3)
    vh = v.reshape(B, T, H, dh).transpose(0, 2, 1, 3)

    s = jnp.einsum('bhqd,bhkd->bhqk', qh, kh)
    allowed = (attn_mask[None, None] != 0) & (key_padding_mask[:, None, None, :] != 0)
    s = jnp.where(allowed, s, -jnp.inf)
    attn = jax.nn.softmax(s, axis=-1)
    ctx = jnp.einsum('bhqk,bhkd->bhqd', attn, vh)
    ctx = ctx.transpose(0, 2, 1, 3).reshape(B, T, D)
    out = ctx @ wo.T + bo
    return out, xn


if __name__ == "__main__":
    B, T, D, H = 2, 8, 32, 4

    key = jax.random.PRNGKey(0)
    k_x, k_w, k_b, k_wo, k_bo = jax.random.split(key, 5)

    # Deterministic parameter init (synthetic; shapes match the PyTorch module).
    gamma = jnp.ones((D,), jnp.float32)                            # LayerNorm weight
    beta = jnp.zeros((D,), jnp.float32)                            # LayerNorm bias
    wqkv = 0.1 * jax.random.normal(k_w, (3 * D, D), jnp.float32)   # in_proj_weight
    bqkv = 0.05 * jax.random.normal(k_b, (3 * D,), jnp.float32)    # in_proj_bias
    wo = 0.1 * jax.random.normal(k_wo, (D, D), jnp.float32)        # out_proj.weight
    bo = 0.05 * jax.random.normal(k_bo, (D,), jnp.float32)         # out_proj.bias
    params = (gamma, beta, wqkv, bqkv, wo, bo)

    x = jax.random.normal(k_x, (B, T, D), jnp.float32)

    # key_padding_mask: True = valid. Batch 1 has 2 padded (invalid) positions at the end.
    key_padding_mask = jnp.ones((B, T), dtype=bool).at[1, T - 2:].set(False)
    # attn_mask: True = allowed (causal).
    attn_mask = jnp.tril(jnp.ones((T, T), dtype=bool))

    out, cache = transformer_mhsa_forward(
        x, key_padding_mask, attn_mask, params, num_heads=H, batch_first=True)
    jax.block_until_ready((out, cache))

    ref_out, ref_cache = _reference_forward(
        x, key_padding_mask, attn_mask, params, num_heads=H)
    # bf16 MXU operands (f32 accumulation) vs. the all-f32 reference.
    assert jnp.allclose(out, ref_out, atol=2e-2, rtol=2e-2)
    assert jnp.allclose(cache, ref_cache, atol=2e-2, rtol=2e-2)

    print("KERNEL_OK")
</pallas_src>

<mosaic_0001>
module attributes {stable_mosaic.version = 11 : i64} {
  func.func @_mhsa_kernel(%arg0: i32, %arg1: memref<1x8x32xf32, #tpu.memory_space<vmem>>, %arg2: memref<1x1x8xi32, #tpu.memory_space<vmem>>, %arg3: memref<8x8xi32, #tpu.memory_space<vmem>>, %arg4: memref<1x32xf32, #tpu.memory_space<vmem>>, %arg5: memref<1x32xf32, #tpu.memory_space<vmem>>, %arg6: memref<32x96xbf16, #tpu.memory_space<vmem>>, %arg7: memref<1x96xf32, #tpu.memory_space<vmem>>, %arg8: memref<32x32xbf16, #tpu.memory_space<vmem>>, %arg9: memref<1x32xf32, #tpu.memory_space<vmem>>, %arg10: memref<1x8x32xf32, #tpu.memory_space<vmem>>, %arg11: memref<1x8x32xf32, #tpu.memory_space<vmem>>) attributes {dimension_semantics = [#tpu.dimension_semantics<parallel>], iteration_bounds = array<i64: 2>, scalar_prefetch = 0 : i64, scratch_operands = 0 : i64, tpu.core_type = #tpu.core_type<tc>, window_params = [{transform_indices = @transform_0, window_bounds = array<i64: 1, 8, 32>}, {transform_indices = @transform_1, window_bounds = array<i64: 1, 1, 8>}, {pipeline_mode = #tpu.pipeline_mode<synchronous>, transform_indices = @transform_2, window_bounds = array<i64: 8, 8>}, {pipeline_mode = #tpu.pipeline_mode<synchronous>, transform_indices = @transform_3, window_bounds = array<i64: 1, 32>}, {pipeline_mode = #tpu.pipeline_mode<synchronous>, transform_indices = @transform_4, window_bounds = array<i64: 1, 32>}, {pipeline_mode = #tpu.pipeline_mode<synchronous>, transform_indices = @transform_5, window_bounds = array<i64: 32, 96>}, {pipeline_mode = #tpu.pipeline_mode<synchronous>, transform_indices = @transform_6, window_bounds = array<i64: 1, 96>}, {pipeline_mode = #tpu.pipeline_mode<synchronous>, transform_indices = @transform_7, window_bounds = array<i64: 32, 32>}, {pipeline_mode = #tpu.pipeline_mode<synchronous>, transform_indices = @transform_8, window_bounds = array<i64: 1, 32>}, {transform_indices = @transform_9, window_bounds = array<i64: 1, 8, 32>}, {transform_indices = @transform_10, window_bounds = array<i64: 1, 8, 32>}]} {
    %c0 = arith.constant 0 : index
    %c0_0 = arith.constant 0 : index
    %c0_1 = arith.constant 0 : index
    %0 = vector.load %arg1[%c0, %c0_0, %c0_1] : memref<1x8x32xf32, #tpu.memory_space<vmem>>, vector<1x8x32xf32>
    %1 = vector.shape_cast %0 : vector<1x8x32xf32> to vector<8x32xf32>
    %cst = arith.constant dense<0.000000e+00> : vector<8xf32>
    %2 = vector.multi_reduction <add>, %1, %cst [1] : vector<8x32xf32> to vector<8xf32>
    %3 = vector.shape_cast %2 : vector<8xf32> to vector<8x1xf32>
    %cst_2 = arith.constant 3.200000e+01 : f32
    %4 = vector.broadcast %cst_2 : f32 to vector<8x1xf32>
    %5 = arith.divf %3, %4 : vector<8x1xf32>
    %6 = vector.broadcast %5 : vector<8x1xf32> to vector<8x32xf32>
    %7 = arith.subf %1, %6 : vector<8x32xf32>
    %8 = arith.mulf %7, %7 : vector<8x32xf32>
    %cst_3 = arith.constant dense<0.000000e+00> : vector<8xf32>
    %9 = vector.multi_reduction <add>, %8, %cst_3 [1] : vector<8x32xf32> to vector<8xf32>
    %10 = vector.shape_cast %9 : vector<8xf32> to vector<8x1xf32>
    %cst_4 = arith.constant 3.200000e+01 : f32
    %11 = vector.broadcast %cst_4 : f32 to vector<8x1xf32>
    %12 = arith.divf %10, %11 : vector<8x1xf32>
    %13 = vector.broadcast %5 : vector<8x1xf32> to vector<8x32xf32>
    %14 = arith.subf %1, %13 : vector<8x32xf32>
    %cst_5 = arith.constant 9.99999974E-6 : f32
    %15 = vector.broadcast %cst_5 : f32 to vector<8x1xf32>
    %16 = arith.addf %12, %15 : vector<8x1xf32>
    %17 = math.rsqrt %16 : vector<8x1xf32>
    %18 = vector.broadcast %17 : vector<8x1xf32> to vector<8x32xf32>
    %19 = arith.mulf %14, %18 : vector<8x32xf32>
    %c0_6 = arith.constant 0 : index
    %c0_7 = arith.constant 0 : index
    %20 = vector.load %arg4[%c0_6, %c0_7] : memref<1x32xf32, #tpu.memory_space<vmem>>, vector<1x32xf32>
    %21 = vector.broadcast %20 : vector<1x32xf32> to vector<8x32xf32>
    %22 = arith.mulf %19, %21 : vector<8x32xf32>
    %c0_8 = arith.constant 0 : index
    %c0_9 = arith.constant 0 : index
    %23 = vector.load %arg5[%c0_8, %c0_9] : memref<1x32xf32, #tpu.memory_space<vmem>>, vector<1x32xf32>
    %24 = vector.broadcast %23 : vector<1x32xf32> to vector<8x32xf32>
    %25 = arith.addf %22, %24 : vector<8x32xf32>
    %c0_10 = arith.constant 0 : index
    %c0_11 = arith.constant 0 : index
    %c0_12 = arith.constant 0 : index
    %26 = vector.load %arg11[%c0_10, %c0_11, %c0_12] : memref<1x8x32xf32, #tpu.memory_space<vmem>>, vector<1x8x32xf32>
    %27 = vector.shape_cast %26 : vector<1x8x32xf32> to vector<8x32xf32>
    %28 = vector.shape_cast %25 : vector<8x32xf32> to vector<1x8x32xf32>
    tpu.vector_store %arg11[%c0_10, %c0_11, %c0_12], %28 {strides = array<i32>} : memref<1x8x32xf32, #tpu.memory_space<vmem>>, vector<1x8x32xf32>,
    %29 = arith.truncf %25 : vector<8x32xf32> to vector<8x32xbf16>
    %c0_13 = arith.constant 0 : index
    %c0_14 = arith.constant 0 : index
    %30 = vector.load %arg6[%c0_13, %c0_14] : memref<32x96xbf16, #tpu.memory_space<vmem>>, vector<32x96xbf16>
    %cst_15 = arith.constant dense<0.000000e+00> : vector<8x96xf32>
    %31 = tpu.matmul %29, %30, %cst_15 {dimension_numbers = #tpu.dot_dimension_numbers<[1], [0], [0], [1], [0, 0, 1, 1], [], []>} : vector<8x32xbf16>, vector<32x96xbf16>, vector<8x96xf32> -> vector<8x96xf32>
    %c0_16 = arith.constant 0 : index
    %c0_17 = arith.constant 0 : index
    %32 = vector.load %arg7[%c0_16, %c0_17] : memref<1x96xf32, #tpu.memory_space<vmem>>, vector<1x96xf32>
    %33 = vector.broadcast %32 : vector<1x96xf32> to vector<8x96xf32>
    %34 = arith.addf %31, %33 : vector<8x96xf32>
    %35 = arith.truncf %34 : vector<8x96xf32> to vector<8x96xbf16>
    %36 = vector.extract_strided_slice %35 {offsets = [0, 0], sizes = [8, 32], strides = [1, 1]} : vector<8x96xbf16> to vector<8x32xbf16>
    %37 = vector.shape_cast %36 : vector<8x32xbf16> to vector<8x4x8xbf16>
    %38 = tpu.transpose %37, [1, 0, 2] : vector<8x4x8xbf16> -> vector<4x8x8xbf16>
    %39 = vector.extract_strided_slice %35 {offsets = [0, 32], sizes = [8, 32], strides = [1, 1]} : vector<8x96xbf16> to vector<8x32xbf16>
    %40 = vector.shape_cast %39 : vector<8x32xbf16> to vector<8x4x8xbf16>
    %41 = tpu.transpose %40, [1, 0, 2] : vector<8x4x8xbf16> -> vector<4x8x8xbf16>
    %42 = vector.extract_strided_slice %35 {offsets = [0, 64], sizes = [8, 32], strides = [1, 1]} : vector<8x96xbf16> to vector<8x32xbf16>
    %43 = vector.shape_cast %42 : vector<8x32xbf16> to vector<8x4x8xbf16>
    %44 = tpu.transpose %43, [1, 0, 2] : vector<8x4x8xbf16> -> vector<4x8x8xbf16>
    %c0_18 = arith.constant 0 : index
    %c0_19 = arith.constant 0 : index
    %c0_20 = arith.constant 0 : index
    %45 = vector.load %arg2[%c0_18, %c0_19, %c0_20] : memref<1x1x8xi32, #tpu.memory_space<vmem>>, vector<1x1x8xi32>
    %46 = vector.shape_cast %45 : vector<1x1x8xi32> to vector<1x8xi32>
    %c0_21 = arith.constant 0 : index
    %c0_22 = arith.constant 0 : index
    %47 = vector.load %arg3[%c0_21, %c0_22] : memref<8x8xi32, #tpu.memory_space<vmem>>, vector<8x8xi32>
    %c0_i32 = arith.constant 0 : i32
    %48 = vector.broadcast %c0_i32 : i32 to vector<8x8xi32>
    %49 = arith.cmpi ne, %47, %48 : vector<8x8xi32>
    %c0_i32_23 = arith.constant 0 : i32
    %50 = vector.broadcast %c0_i32_23 : i32 to vector<1x8xi32>
    %51 = arith.cmpi ne, %46, %50 : vector<1x8xi32>
    %52 = vector.broadcast %51 : vector<1x8xi1> to vector<8x8xi1>
    %53 = arith.andi %49, %52 : vector<8x8xi1>
    %cst_24 = arith.constant 0.000000e+00 : f32
    %cst_25 = arith.constant -1.000000e+30 : f32
    %54 = vector.broadcast %cst_24 : f32 to vector<8x8xf32>
    %55 = vector.broadcast %cst_25 : f32 to vector<8x8xf32>
    %56 = arith.select %53, %54, %55 : vector<8x8xi1>, vector<8x8xf32>
    "tpu.trace_start"() <{level = 10 : i32, message = "hqd,hkd->hqk"}> : () -> ()
    %cst_26 = arith.constant dense<0.000000e+00> : vector<4x8x8xf32>
    %57 = tpu.matmul %38, %41, %cst_26 {dimension_numbers = #tpu.dot_dimension_numbers<[2], [2], [1], [1], [0, 0, 0, 1, 1, 1], [0], [0]>} : vector<4x8x8xbf16>, vector<4x8x8xbf16>, vector<4x8x8xf32> -> vector<4x8x8xf32>
    "tpu.trace_stop"() : () -> ()
    %58 = vector.shape_cast %56 : vector<8x8xf32> to vector<1x8x8xf32>
    %59 = vector.broadcast %58 : vector<1x8x8xf32> to vector<4x8x8xf32>
    %60 = arith.addf %57, %59 : vector<4x8x8xf32>
    %cst_27 = arith.constant dense<0xFF800000> : vector<4x8xf32>
    %61 = vector.multi_reduction <maximumf>, %60, %cst_27 [2] : vector<4x8x8xf32> to vector<4x8xf32>
    %62 = vector.shape_cast %61 : vector<4x8xf32> to vector<4x8x1xf32>
    %63 = vector.broadcast %62 : vector<4x8x1xf32> to vector<4x8x8xf32>
    %64 = arith.subf %60, %63 : vector<4x8x8xf32>
    %65 = math.exp %64 : vector<4x8x8xf32>
    %cst_28 = arith.constant dense<0.000000e+00> : vector<4x8xf32>
    %66 = vector.multi_reduction <add>, %65, %cst_28 [2] : vector<4x8x8xf32> to vector<4x8xf32>
    %67 = vector.shape_cast %66 : vector<4x8xf32> to vector<4x8x1xf32>
    %68 = arith.truncf %65 : vector<4x8x8xf32> to vector<4x8x8xbf16>
    "tpu.trace_start"() <{level = 10 : i32, message = "hqk,hkd->hqd"}> : () -> ()
    %cst_29 = arith.constant dense<0.000000e+00> : vector<4x8x8xf32>
    %69 = tpu.matmul %68, %44, %cst_29 {dimension_numbers = #tpu.dot_dimension_numbers<[2], [1], [1], [2], [0, 0, 0, 1, 1, 2], [0], [0]>} : vector<4x8x8xbf16>, vector<4x8x8xbf16>, vector<4x8x8xf32> -> vector<4x8x8xf32>
    "tpu.trace_stop"() : () -> ()
    %70 = tpu.reciprocal %67 {approx = true} : vector<4x8x1xf32> -> vector<4x8x1xf32>
    %71 = vector.broadcast %70 : vector<4x8x1xf32> to vector<4x8x8xf32>
    %72 = arith.mulf %69, %71 : vector<4x8x8xf32>
    %73 = arith.truncf %72 : vector<4x8x8xf32> to vector<4x8x8xbf16>
    %74 = vector.extract_strided_slice %73 {offsets = [0, 0, 0], sizes = [1, 8, 8], strides = [1, 1, 1]} : vector<4x8x8xbf16> to vector<1x8x8xbf16>
    %75 = vector.shape_cast %74 : vector<1x8x8xbf16> to vector<8x8xbf16>
    %c0_30 = arith.constant 0 : index
    %c0_31 = arith.constant 0 : index
    %76 = vector.load %arg8[%c0_30, %c0_31] : memref<32x32xbf16, #tpu.memory_space<vmem>>, vector<8x32xbf16>
    %cst_32 = arith.constant dense<0.000000e+00> : vector<8x32xf32>
    %77 = tpu.matmul %75, %76, %cst_32 {dimension_numbers = #tpu.dot_dimension_numbers<[1], [0], [0], [1], [0, 0, 1, 1], [], []>} : vector<8x8xbf16>, vector<8x32xbf16>, vector<8x32xf32> -> vector<8x32xf32>
    %78 = vector.extract_strided_slice %73 {offsets = [1, 0, 0], sizes = [1, 8, 8], strides = [1, 1, 1]} : vector<4x8x8xbf16> to vector<1x8x8xbf16>
    %79 = vector.shape_cast %78 : vector<1x8x8xbf16> to vector<8x8xbf16>
    %c8 = arith.constant 8 : index
    %c0_33 = arith.constant 0 : index
    %80 = vector.load %arg8[%c8, %c0_33] : memref<32x32xbf16, #tpu.memory_space<vmem>>, vector<8x32xbf16>
    %cst_34 = arith.constant dense<0.000000e+00> : vector<8x32xf32>
    %81 = tpu.matmul %79, %80, %cst_34 {dimension_numbers = #tpu.dot_dimension_numbers<[1], [0], [0], [1], [0, 0, 1, 1], [], []>} : vector<8x8xbf16>, vector<8x32xbf16>, vector<8x32xf32> -> vector<8x32xf32>
    %82 = arith.addf %77, %81 : vector<8x32xf32>
    %83 = vector.extract_strided_slice %73 {offsets = [2, 0, 0], sizes = [1, 8, 8], strides = [1, 1, 1]} : vector<4x8x8xbf16> to vector<1x8x8xbf16>
    %84 = vector.shape_cast %83 : vector<1x8x8xbf16> to vector<8x8xbf16>
    %c16 = arith.constant 16 : index
    %c0_35 = arith.constant 0 : index
    %85 = vector.load %arg8[%c16, %c0_35] : memref<32x32xbf16, #tpu.memory_space<vmem>>, vector<8x32xbf16>
    %cst_36 = arith.constant dense<0.000000e+00> : vector<8x32xf32>
    %86 = tpu.matmul %84, %85, %cst_36 {dimension_numbers = #tpu.dot_dimension_numbers<[1], [0], [0], [1], [0, 0, 1, 1], [], []>} : vector<8x8xbf16>, vector<8x32xbf16>, vector<8x32xf32> -> vector<8x32xf32>
    %87 = arith.addf %82, %86 : vector<8x32xf32>
    %88 = vector.extract_strided_slice %73 {offsets = [3, 0, 0], sizes = [1, 8, 8], strides = [1, 1, 1]} : vector<4x8x8xbf16> to vector<1x8x8xbf16>
    %89 = vector.shape_cast %88 : vector<1x8x8xbf16> to vector<8x8xbf16>
    %c24 = arith.constant 24 : index
    %c0_37 = arith.constant 0 : index
    %90 = vector.load %arg8[%c24, %c0_37] : memref<32x32xbf16, #tpu.memory_space<vmem>>, vector<8x32xbf16>
    %cst_38 = arith.constant dense<0.000000e+00> : vector<8x32xf32>
    %91 = tpu.matmul %89, %90, %cst_38 {dimension_numbers = #tpu.dot_dimension_numbers<[1], [0], [0], [1], [0, 0, 1, 1], [], []>} : vector<8x8xbf16>, vector<8x32xbf16>, vector<8x32xf32> -> vector<8x32xf32>
    %92 = arith.addf %87, %91 : vector<8x32xf32>
    %c0_39 = arith.constant 0 : index
    %c0_40 = arith.constant 0 : index
    %93 = vector.load %arg9[%c0_39, %c0_40] : memref<1x32xf32, #tpu.memory_space<vmem>>, vector<1x32xf32>
    %94 = vector.broadcast %93 : vector<1x32xf32> to vector<8x32xf32>
    %95 = arith.addf %92, %94 : vector<8x32xf32>
    %c0_41 = arith.constant 0 : index
    %c0_42 = arith.constant 0 : index
    %c0_43 = arith.constant 0 : index
    %96 = vector.load %arg10[%c0_41, %c0_42, %c0_43] : memref<1x8x32xf32, #tpu.memory_space<vmem>>, vector<1x8x32xf32>
    %97 = vector.shape_cast %96 : vector<1x8x32xf32> to vector<8x32xf32>
    %98 = vector.shape_cast %95 : vector<8x32xf32> to vector<1x8x32xf32>
    tpu.vector_store %arg10[%c0_41, %c0_42, %c0_43], %98 {strides = array<i32>} : memref<1x8x32xf32, #tpu.memory_space<vmem>>, vector<1x8x32xf32>,
    return
  }
  func.func @transform_0(%arg0: i32) -> (i32, i32, i32) {
    %c0_i32 = arith.constant 0 : i32
    %c0_i32_0 = arith.constant 0 : i32
    %c0_i32_1 = arith.constant 0 : i32
    return %arg0, %c0_i32, %c0_i32_0 : i32, i32, i32
  }
  func.func @transform_1(%arg0: i32) -> (i32, i32, i32) {
    %c0_i32 = arith.constant 0 : i32
    %c0_i32_0 = arith.constant 0 : i32
    %c0_i32_1 = arith.constant 0 : i32
    return %arg0, %c0_i32, %c0_i32_0 : i32, i32, i32
  }
  func.func @transform_2(%arg0: i32) -> (i32, i32) {
    %c0_i32 = arith.constant 0 : i32
    %c0_i32_0 = arith.constant 0 : i32
    %c0_i32_1 = arith.constant 0 : i32
    return %c0_i32, %c0_i32_0 : i32, i32
  }
  func.func @transform_3(%arg0: i32) -> (i32, i32) {
    %c0_i32 = arith.constant 0 : i32
    %c0_i32_0 = arith.constant 0 : i32
    %c0_i32_1 = arith.constant 0 : i32
    return %c0_i32, %c0_i32_0 : i32, i32
  }
  func.func @transform_4(%arg0: i32) -> (i32, i32) {
    %c0_i32 = arith.constant 0 : i32
    %c0_i32_0 = arith.constant 0 : i32
    %c0_i32_1 = arith.constant 0 : i32
    return %c0_i32, %c0_i32_0 : i32, i32
  }
  func.func @transform_5(%arg0: i32) -> (i32, i32) {
    %c0_i32 = arith.constant 0 : i32
    %c0_i32_0 = arith.constant 0 : i32
    %c0_i32_1 = arith.constant 0 : i32
    return %c0_i32, %c0_i32_0 : i32, i32
  }
  func.func @transform_6(%arg0: i32) -> (i32, i32) {
    %c0_i32 = arith.constant 0 : i32
    %c0_i32_0 = arith.constant 0 : i32
    %c0_i32_1 = arith.constant 0 : i32
    return %c0_i32, %c0_i32_0 : i32, i32
  }
  func.func @transform_7(%arg0: i32) -> (i32, i32) {
    %c0_i32 = arith.constant 0 : i32
    %c0_i32_0 = arith.constant 0 : i32
    %c0_i32_1 = arith.constant 0 : i32
    return %c0_i32, %c0_i32_0 : i32, i32
  }
  func.func @transform_8(%arg0: i32) -> (i32, i32) {
    %c0_i32 = arith.constant 0 : i32
    %c0_i32_0 = arith.constant 0 : i32
    %c0_i32_1 = arith.constant 0 : i32
    return %c0_i32, %c0_i32_0 : i32, i32
  }
  func.func @transform_9(%arg0: i32) -> (i32, i32, i32) {
    %c0_i32 = arith.constant 0 : i32
    %c0_i32_0 = arith.constant 0 : i32
    %c0_i32_1 = arith.constant 0 : i32
    return %arg0, %c0_i32, %c0_i32_0 : i32, i32, i32
  }
  func.func @transform_10(%arg0: i32) -> (i32, i32, i32) {
    %c0_i32 = arith.constant 0 : i32
    %c0_i32_0 = arith.constant 0 : i32
    %c0_i32_1 = arith.constant 0 : i32
    return %arg0, %c0_i32, %c0_i32_0 : i32, i32, i32
  }
}

</mosaic_0001>

<bundles_post_ra>
// kernel: tpu_custom_call.1
= control target key start
LH: loop header
LB: loop body
LE: loop exit
PB: predicated region body
PF: predicated region fallthrough
CT: control target
= control target key end

     0   :  { %s2296_s0 = inlined_call_operand.hbm [shape: f32[2,8,32], index: 0, kind: input, shape index: {}]   ;;  %s2297_s1 = inlined_call_operand.hbm [shape: s32[2,1,8], index: 1, kind: input, shape index: {}]   ;;  %s2298_s2 = inlined_call_operand.hbm [shape: s32[8,8], index: 2, kind: input, shape index: {}]   ;;  %s2299_s3 = inlined_call_operand.vmem [shape: f32[1,32], index: 3, kind: input, shape index: {}]   ;;  %s2300_s4 = inlined_call_operand.vmem [shape: f32[1,32], index: 4, kind: input, shape index: {}]   ;;  %s2301_s5 = inlined_call_operand.hbm [shape: bf16[32,96], index: 5, kind: input, shape index: {}]   ;;  %s2302_s6 = inlined_call_operand.vmem [shape: f32[1,96], index: 6, kind: input, shape index: {}]   ;;  %s2303_s7 = inlined_call_operand.hbm [shape: bf16[32,32], index: 7, kind: input, shape index: {}]   ;;  %s2304_s8 = inlined_call_operand.vmem [shape: f32[1,32], index: 8, kind: input, shape index: {}]   ;;  %s2305_s9 = inlined_call_operand.hbm [shape: f32[2,8,32], index: 9, kind: output, shape index: {0}]   ;;  %s2306_s10 = inlined_call_operand.hbm [shape: f32[2,8,32], index: 10, kind: output, shape index: {1}]  }
   0x1   :  { %2313 = sst [smem:[#allocation26_spill]] %s2298_s2 }
   0x2   :  { %2314 = sst [smem:[#allocation27_spill]] %s2301_s5 }
   0x3   :  { %2315 = sst [smem:[#allocation28_spill]] %s2303_s7 }
   0x4   :  { %16 = vsyncpa [#allocation3], 0 }
   0x5   :  { %18 = vsyncpa [#allocation3 + $0x1], 0 }
   0x6   :  { %19 = vsyncpa [#allocation6], 0 }
   0x7   :  { %21 = vsyncpa [#allocation6 + $0x1], 0 }
   0x8   :  { %22 = vsyncpa [#allocation9], 0 }
   0x9   :  { %23 = vsyncpa [#allocation4], 0 }
   0xa   :  { %25 = vsyncpa [#allocation4 + $0x1], 0 }
   0xb   :  { %26 = vsyncpa [#allocation13], 0 }
   0xc   :  { %28 = vsyncpa [#allocation13 + $0x1], 0  ;;  %s1904_s13 = smov 0   ;;  %s1906_s14 = smov 0  }
   0xd   :  { %s1908_s15 = smov 0   ;;  %s1910_s16 = smov 0  }
   0xe LB: > { %2316 = sst [smem:[#allocation20_spill]] %s1820_s13  ;;  %s1925_s17 = sadd.s32 4294967295, %s1832_s16   ;;  %s1832_s16 = sphi %s1910_s16, %s2335_s16   ;;  %s1828_s15 = sphi %s1908_s15, %s2337_s15   ;;  %s1824_s14 = sphi %s1906_s14, %s2339_s14   ;;  %s1820_s13 = sphi %s1904_s13, %s2338_s13  }
   0xf   : > { %2317 = sst [smem:[#allocation21_spill]] %s1828_s15  ;;  %s1405_s18 = sadd.s32 4294967294, %s1832_s16  }
  0x10   : > { %2318 = sst [smem:[#allocation22_spill]] %s1832_s16  ;;  %p54_p0 = scmp.ne.s32.totalorder %s1824_s14, %s1820_s13 }
  0x11   : > { %p55_p1 = scmp.eq.s32.totalorder %s1925_s17, 0  ;;  %p251_p2 = scmp.eq.s32.totalorder %s1925_s17, 1 }
  0x12   : > { %p257_p3 = scmp.eq.s32.totalorder %s1405_s18, 1  ;;  %p1406_p5 = scmp.ge.s32.totalorder %s1832_s16, 1 }
  0x13   : > { %p1934_p4 = por %p55_p1, %p54_p0  ;;  %p290_p7 = scmp.lt.s32.totalorder %s1832_s16, 3 }
  0x14   : > { %p1939_p6 = por %p257_p3, %p54_p0  ;;  %s2322_s2 = sld [smem:[#allocation26_spill]] }
  0x15   : > { %p1947_p8 = pnand %p1406_p5, %p290_p7  ;;  %s1834_s25 = smov [#allocation7]  }
  0x16   : > { %s2320_s20 = scalar_select %p1939_p6, 1, 0 }
  0x17   : > { %p1469_p10 = pneg %p1947_p8  ;;  %s304_s26 = sshll.u32 %s1834_s25, 4  ;;  %s305_s26 = int_to_ptr.vmem [resolvable:$true] %s304_s26 }
  0x18   : > { %2321 = sst [smem:[#allocation23_spill]] %s2320_s20  ;;  %s1835_s11 = smov [#allocation8]  }
  0x19   : > { %s2324_s5 = sld [smem:[#allocation27_spill]]  ;;  %p1959_p11 = pnand %p1469_p10, %p55_p1 }
  0x1a   : > { %s302_s23 = sshll.u32 %s2322_s2, 4  ;;  %s321_s12 = sshll.u32 %s1835_s11, 4  ;;  %s303_s23 = int_to_ptr.hbm [resolvable:$true] %s302_s23  ;;  %s322_s12 = int_to_ptr.vmem [resolvable:$true] %s321_s12 }
  0x1b   : > { %1472 = dma.hbm_to_vmem [thread:$0]  (!%p1959_p11), %s303_s23, 128, %s305_s26, [#allocation6]  }
  0x1c   : > { %s1836_s18 = smov 64   ;;  %s1837_s21 = smov 4  }
  0x1d   : > { %s2326_s7 = sld [smem:[#allocation28_spill]]  ;;  %s1838_s28 = smov [#allocation10]  }
  0x1e   : > { %s338_s11 = sshll.u32 %s1838_s28, 4  ;;  %s1973_s23 = sadd.s32 1, %s1832_s16   ;;  %s339_s11 = int_to_ptr.vmem [resolvable:$true] %s338_s11 }
  0x1f   : > { %s319_s29 = sshll.u32 %s2324_s5, 4  ;;  %2327 = sst [smem:[#allocation24_spill]] %s1973_s23  ;;  %s320_s29 = int_to_ptr.hbm [resolvable:$true] %s319_s29 }
  0x20   : > { %1475 = dma.hbm_to_vmem [thread:$0]  (!%p1959_p11), %s320_s29, 256, %s322_s12, [#allocation9], %s1836_s18, %s1836_s18, %s1837_s21  }
  0x21   : > { %s38_s26 = ssub.s32 %s1832_s16, %s1973_s23  ;;  %s41_s2 = sadd.s32 1, %s1828_s15 }
  0x22   : > { %p39_p12 = scmp.eq.s32.totalorder %s38_s26, 0  ;;  %p48_p13 = scmp.ne.s32.totalorder %s1828_s15, %s1824_s14 }
  0x23   : > { %s336_s27 = sshll.u32 %s2326_s7, 4  ;;  %p49_p0 = scmp.eq.s32.totalorder %s1832_s16, 0  ;;  %s337_s27 = int_to_ptr.hbm [resolvable:$true] %s336_s27 }
  0x24   : > { %1478 = dma.hbm_to_vmem [thread:$0]  (!%p1959_p11), %s337_s27, 256, %s339_s11, [#allocation9], %s1836_s18, %s1836_s18, %s1837_s21  }
  0x25   : > { %p1496_p3 = scmp.lt.s32.totalorder %s1832_s16, 2  ;;  %p50_p5 = por %p49_p0, %p48_p13 }
  0x26   : > { %s1983_s29 = scalar_select %p39_p12, %s1828_s15, %s41_s2  }
  0x27   : > { %p1987_p7 = por %p251_p2, %p48_p13  ;;  %s1992_s30 = sand.u32 1, %s1828_s15  }
  0x28   : > { %2328 = sst [smem:[#allocation25_spill]] %s1983_s29  ;;  %s1412_s18 = sshll.u32 %s1832_s16, 3 }
  0x29   : > { %s1411_s21 = sshll.u32 %s1992_s30, 3  ;;  %s363_s27 = scalar_lea.hbm %s2296_s0, %s1412_s18 }
  0x2a   : > { %s365_s28 = sshll.u32 %s363_s27, 4  ;;  %s359_s11 = scalar_lea.vmem [#allocation2], %s1411_s21  ;;  %s366_s28 = int_to_ptr.hbm [resolvable:$true] %s365_s28 }
  0x2b   : > { %s367_s2 = sshll.u32 %s359_s11, 4  ;;  %p2001_p2 = pnand %p1496_p3, %p50_p5  ;;  %s368_s2 = int_to_ptr.vmem [resolvable:$true] %s367_s2 }
  0x2c   : > { %s374_s5 = sand.u32 1, %s1832_s16   ;;  %s380_s15 = scalar_lea.hbm %s2297_s1, %s1832_s16 }
  0x2d   : > { %s356_s23 = scalar_lea.sflag [#allocation3], %s1992_s30  ;;  %s1662_s22 = sshra.s32 %s366_s28, 4  ;;  %s1663_s22 = int_to_ptr.hbm [resolvable:$true] %s1662_s22 }
  0x2e   : > { %s1664_s18 = scalar_lea.hbm %s1663_s22, 8  ;;  %p1666_p11 = pneg %p2001_p2 }
  0x2f   : > { %p1665_p10 = scmp.ne.s32.totalorder %s1663_s22, %s1664_s18  ;;  %s1669_s27 = scalar_lea.hbm %s2296_s0, 16 }
  0x30   : > { %p1670_p0 = scmp.lt.s32.totalorder %s1663_s22, %s2296_s0  ;;  %p1671_p3 = scmp.lt.s32.totalorder %s1669_s27, %s1664_s18 }
  0x31   : > { %p1667_p12 = pnand %p1666_p11, %p1665_p10 }
  0x32   : > { %p1672_p5 = por %p1671_p3, %p1670_p0 }
  0x33   : > { %p1668_p13 = pneg %p1667_p12 }
  0x35   : > { %p1673_p9 = pnand %p1672_p5, %p1668_p13 }
  0x37   : > { %1676 = shalt.err (!%p1673_p9)
}
  0x38   : > { %1482 = dma.hbm_to_vmem [thread:$0]  (!%p2001_p2), %s366_s28, 128, %s368_s2, %s356_s23  }
  0x39   : > { %s382_s7 = sshll.u32 %s380_s15, 4  ;;  %s377_s29 = scalar_lea.vmem [#allocation5], %s1992_s30  ;;  %s383_s7 = int_to_ptr.hbm [resolvable:$true] %s382_s7 }
  0x3a   : > { %s384_s16 = sshll.u32 %s377_s29, 4  ;;  %s375_s21 = scalar_lea.sflag [#allocation6], %s374_s5  ;;  %s385_s16 = int_to_ptr.vmem [resolvable:$true] %s384_s16 }
  0x3b   : > { %s1692_s25 = sshra.s32 %s383_s7, 4  ;;  %s1699_s18 = scalar_lea.hbm %s2297_s1, 2  ;;  %s1693_s25 = int_to_ptr.hbm [resolvable:$true] %s1692_s25 }
  0x3c   : > { %s1694_s13 = scalar_lea.hbm %s1693_s25, 1  ;;  %p1700_p9 = scmp.lt.s32.totalorder %s1693_s25, %s2297_s1 }
  0x3d   : > { %p1695_p10 = scmp.ne.s32.totalorder %s1693_s25, %s1694_s13  ;;  %p1701_p0 = scmp.lt.s32.totalorder %s1699_s18, %s1694_s13 }
  0x3f   : > { %p1697_p12 = pnand %p1695_p10, %p1666_p11  ;;  %p1702_p3 = por %p1701_p0, %p1700_p9 }
  0x41   : > { %p1698_p13 = pneg %p1697_p12 }
  0x43   : > { %p1703_p5 = pnand %p1702_p3, %p1698_p13 }
  0x45   : > { %1706 = shalt.err (!%p1703_p5)
}
  0x46   : > { %1485 = dma.hbm_to_vmem [thread:$0]  (!%p2001_p2), %s383_s7, 16, %s385_s16, %s375_s21  }
  0x47   : > { %393 = sbr.rel (%p1947_p8) target bundleno = 1302 (0x516), region = 56  ;;  %s2039_s5 = sand.u32 (!%p1947_p8), 1, %s1824_s14  }
  0x48   : > { %s2042_s15 = sshll.u32 (!%p1947_p8), %s2039_s5, 3  ;;  %s396_s30 = scalar_lea.sflag (!%p1947_p8), [#allocation3], %s2039_s5 }
  0x49   : > { %s399_s13 = scalar_lea.vmem (!%p1947_p8), [#allocation2], %s2042_s15 }
  0x4c   : > { %1795 = dma.done.wait (%p1934_p4), %s396_s30, 128  }
  0x4d   : > { %1797 = vsyncadd (%p1934_p4), %s396_s30, 4294967168  ;;  %s405_s16 = sand.u32 1, %s1925_s17   ;;  %s408_s28 = scalar_lea.vmem [#allocation5], %s2039_s5 }
  0x4e   : > { %s406_s24 = scalar_lea.sflag [#allocation6], %s405_s16 }
  0x4f   : > { %1799 = dma.done.wait (%p1934_p4), %s406_s24, 16  }
  0x50   : > { %1801 = vsyncadd (%p1934_p4), %s406_s24, 4294967280 }
  0x51   : > { %1803 = dma.done.wait (%p55_p1), [#allocation6], 128  }
  0x52   : > { %1805 = vsyncadd (%p55_p1), [#allocation6], 4294967168 }
  0x53   : > { %1807 = dma.done.wait (%p55_p1), [#allocation9], 512  }
  0x54   : > { %1809 = vsyncadd (%p55_p1), [#allocation9], 4294966784  ;;  %vm472_vm0 = vcmask 261120   ;;  %v471_v0 = vld [vmem:[%s399_s13] sm:$0xff]  ;;  %v1839_v2 = vmov 32.0   ;;  %s469_s7 = scalar_lea.vmem [#allocation12], %s2042_s15 }
  0x55   : > { %v473_v1 = vsel %vm472_vm0, %v471_v0, 0.0  ;;  %1552 = vrcp.f32 %v1839_v2  ;;  %v1448_v14 = vld [vmem:[#allocation8 + $0x8] sm:$0xff]  ;;  %v1447_v15 = vld [vmem:[#allocation8] sm:$0xff]  ;;  %s1840_s25 = smov 104   ;;  %s1841_s20 = smov 120   ;;  %vm581_vm5 = vcmask 1047556  }
  0x56   : > { %474 = vadd.xlane.f32.xlu0 %v473_v1  ;;  %543 = vmatpush.bf16.msra.mxu0 %v1448_v14  ;;  %v1548_v25 = vld [vmem:[%s2299_s3] ss:$0 sm:$0xff]  ;;  %s1842_s22 = smov 96   ;;  %s1843_s18 = smov 112   ;;  %v1844_v38 = vmov 1983009808  }
  0x57   : > { %v1549_v28 = vld [vmem:[%s2300_s4] ss:$0 sm:$0xff]  ;;  %v572_v39 = vunpack.c.l.s4 %v1844_v38  ;;  %s1845_s27 = smov 64   ;;  %v1846_v46 = vmov 1934713408   ;;  %vm926_vm6 = vcmask 64512  }
  0x58   : > { %v1550_v32 = vld [vmem:[%s2302_s6] ss:$0 sm:$0xff]  ;;  %v586_v47 = vunpack.c.l.s4 %v1846_v46  ;;  %vm1046_vm7 = vcmask 1043456   ;;  %s1443_s23 = sshll.u32 %s1925_s17, 3  ;;  %s1252_s24 = sshll.u32 %s469_s7, 4  ;;  %s1253_s24 = int_to_ptr.vmem [resolvable:$true] %s1252_s24 }
  0x59   : > { %v2081_v42 = vunpack.c.0.s8 %v572_v39  ;;  %s1250_s16 = scalar_lea.hbm %s2306_s10, %s1443_s23  ;;  %s1226_s19 = scalar_lea.sflag [#allocation13], %s2039_s5 }
  0x5a   : > { %544 = vmatpush.bf16.msra.mxu0 %v1447_v15  ;;  %v2086_v54 = vunpack.c.0.s8 %v586_v47  ;;  %s1742_s17 = scalar_lea.hbm %s2306_s10, 16 }
  0x5b   : > { %v1553_v3 = vpop.eup %1552 }
  0x5c   : > { %v477_v4 = vmul.f32 32.0, %v1553_v3  ;;  %vm481_vm1 = vweird.f32 %v1553_v3 }
  0x5e   : > { %v478_v5 = vsub.f32 1.0, %v477_v4 }
  0x60   : > { %v479_v6 = vmul.f32 %v1553_v3, %v478_v5 }
  0x62   : > { %v480_v7 = vadd.f32 %v1553_v3, %v479_v6 }
  0x64   : > { %v482_v8 = vsel %vm481_vm1, %v1553_v3, %v480_v7 }
  0xc9   : > { %v475_v9 = vpop.xlane.xlu0 %474 }
  0xca   : > { %v483_v10 = vmul.f32 %v482_v8, %v475_v9 }
  0xcc   : > { %v484_v11 = vsub.f32 %v471_v0, %v483_v10 }
  0xce   : > { %v485_v12 = vmul.f32 %v484_v11, %v484_v11 }
  0xd0   : > { %v486_v13 = vsel %vm472_vm0, %v485_v12, 0.0 }
  0xd1   : > { %487 = vadd.xlane.f32.xlu0 %v486_v13 }
 0x144   : > { %v488_v16 = vpop.xlane.xlu0 %487 }
 0x145   : > { %v489_v17 = vmul.f32 %v488_v16, %v482_v8 }
 0x147   : > { %v490_v18 = vadd.f32 1e-05, %v489_v17 }
 0x149   : > { %1554 = vrsqrt.f32 %v490_v18  ;;  %vm497_vm3 = vweird.f32 %v490_v18 }
 0x14f   : > { %v1555_v19 = vpop.eup %1554 }
 0x150   : > { %v492_v20 = vmul.f32 %v1555_v19, %v490_v18  ;;  %vm498_vm2 = vweird.f32 %v1555_v19 }
 0x151   : > { %vm499_vm4 = vmor %vm497_vm3, %vm498_vm2 }
 0x152   : > { %v493_v21 = vmul.f32 %v1555_v19, %v492_v20 }
 0x154   : > { %v494_v22 = vmul.f32 0.5, %v493_v21 }
 0x156   : > { %v495_v23 = vsub.f32 1.5, %v494_v22 }
 0x158   : > { %v496_v24 = vmul.f32 %v1555_v19, %v495_v23 }
 0x15a   : > { %v500_v26 = vsel %vm499_vm4, %v1555_v19, %v496_v24 }
 0x15b   : > { %v501_v27 = vmul.f32 %v500_v26, %v484_v11 }
 0x15d   : > { %v506_v29 = vmul.f32 %v1548_v25, %v501_v27 }
 0x15f   : > { %v511_v30 = vadd.f32 %v1549_v28, %v506_v29 }
 0x161   : > { %v513_v31 = vpack.c.bf16 %v511_v30, %v511_v30  ;;  %512 = vst.msk [vmem:[%s469_s7] sm:$0xff] %vm472_vm0, %v511_v30 }
 0x163   : > { %1428 = vmatmul.msk.bf16.vlgmr.msra.gmra.mxu0 %vm472_vm0, %v513_v31 }
 0x1e0   : > { %v546_v33 = vpop.f32.mrf.mxu0 }
 0x1e1   : > { %v547_v34 = vadd.f32 %v1550_v32, %v546_v33 }
 0x1e3   : > { %v550_v35 = vpack.c.bf16 %v547_v34, %v547_v34 }
 0x1e5   : > { %556 = vrot.lane.b32.xlu2 %v550_v35, %s1840_s25  ;;  %552 = vrot.lane.b32.xlu1 %v550_v35, %s1841_s20  ;;  %v561_v44 = vshrl.u32 %v550_v35, 16 }
 0x1e8   : > { %v548_v36 = vpop.f32.mrf.mxu0 }
 0x1ed   : > { %673 = vrot.lane.b32.xlu2 %v550_v35, %s1842_s22  ;;  %554 = vrot.lane.b32.xlu1 %v550_v35, %s1843_s18 }
 0x23f   : > { %v557_v37 = vpop.permute.xlu2 %556 }
 0x240   : > { %679 = vrot.lane.b32.xlu2 %v557_v37, %s1842_s22  ;;  %v568_v50 = vshrl.u32 %v557_v37, 16 }
 0x257   : > { %v553_v40 = vpop.permute.xlu1 %552 }
 0x258   : > { %v562_v41 = vshrl.u32 %v553_v40, 16  ;;  %797 = vrot.lane.b32.xlu2 %v553_v40, %s1845_s27  ;;  %675 = vrot.lane.b32.xlu0 %v553_v40, %s1842_s22  ;;  %v560_v43 = vpack.i.b16 %v553_v40, %v550_v35 }
 0x25a   : > { %v563_v45 = vpack.i.b16 %v562_v41, %v561_v44  ;;  %v574_v48 = vperm.slane %v560_v43, %v2081_v42  ;;  %v674_v43 = vpop.permute.xlu2 %673 }
 0x25b   : > { %v684_v46 = vshrl.u32 %v674_v43, 16 }
 0x25c   : > { %v601_v51 = vperm.slane %v563_v45, %v2081_v42  ;;  %v583_v55 = vrot.slane %v574_v48, 4 }
 0x25e   : > { %v609_v58 = vrot.slane %v601_v51, 4 }
 0x25f   : > { %v555_v49 = vpop.permute.xlu1 %554 }
 0x260   : > { %v566_v52 = vpack.i.b16 %v557_v37, %v555_v49  ;;  %v567_v53 = vshrl.u32 %v555_v49, 16  ;;  %801 = vrot.lane.b32.xlu2 %v557_v37, %s1845_s27  ;;  %677 = vrot.lane.b32.xlu1 %v555_v49, %s1842_s22 }
 0x262   : > { %v569_v56 = vpack.i.b16 %v568_v50, %v567_v53  ;;  %v579_v57 = vperm.slane %v566_v52, %v2081_v42 }
 0x264   : > { %v580_v59 = vrot.slane %v579_v57, 4  ;;  %v584_v60 = vsel %vm581_vm5, %v579_v57, %v583_v55  ;;  %v606_v61 = vperm.slane %v569_v56, %v2081_v42 }
 0x265   : > { %v592_v62 = vperm.slane %v584_v60, %v2086_v54 }
 0x266   : > { %v582_v63 = vsel %vm581_vm5, %v580_v59, %v574_v48  ;;  %v607_v0 = vrot.slane %v606_v61, 4  ;;  %v610_v1 = vsel %vm581_vm5, %v606_v61, %v609_v58 }
 0x267   : > { %v588_v2 = vperm.slane %v582_v63, %v2086_v54  ;;  %v595_v3 = vrot.slane %v592_v62, 4  ;;  %v618_v4 = vperm.slane %v610_v1, %v2086_v54 }
 0x268   : > { %v608_v5 = vsel %vm581_vm5, %v607_v0, %v601_v51  ;;  %795 = vrot.lane.b32.xlu1 %v550_v35, %s1845_s27 }
 0x269   : > { %v593_v6 = vrot.slane %v588_v2, 4  ;;  %v596_v7 = vsel %vm581_vm5, 0, %v595_v3  ;;  %v614_v8 = vperm.slane %v608_v5, %v2086_v54  ;;  %v621_v9 = vrot.slane %v618_v4, 4 }
 0x26a   : > { %v628_v10 = vrot.slane %v596_v7, 4  ;;  %v623_v11 = vsel %vm581_vm5, %v595_v3, %v588_v2 }
 0x26b   : > { %v619_v12 = vrot.slane %v614_v8, 4  ;;  %v622_v13 = vsel %vm581_vm5, 0, %v621_v9  ;;  %v594_v14 = vsel %vm581_vm5, 0, %v593_v6  ;;  %v642_v17 = vsel %vm581_vm5, %v621_v9, %v614_v8 }
 0x26c   : > { %v647_v15 = vrot.slane %v622_v13, 4  ;;  %v629_v16 = vsel %vm581_vm5, %v628_v10, %v594_v14  ;;  %v627_v21 = vperm.slane %v623_v11, %v2081_v42  ;;  %v646_v25 = vperm.slane %v642_v17, %v2081_v42 }
 0x26d   : > { %v620_v18 = vsel %vm581_vm5, 0, %v619_v12  ;;  %v633_v19 = vperm.slane %v629_v16, %v2081_v42 }
 0x26e   : > { %v648_v20 = vsel %vm581_vm5, %v647_v15, %v620_v18 }
 0x26f   : > { %v634_v22 = vrot.slane %v633_v19, 4  ;;  %v652_v23 = vperm.slane %v648_v20, %v2081_v42 }
 0x270   : > { %799 = vrot.lane.b32.xlu1 %v555_v49, %s1845_s27 }
 0x271   : > { %v635_v24 = vsel %vm581_vm5, %v634_v22, %v627_v21  ;;  %v653_v26 = vrot.slane %v652_v23, 4 }
 0x272   : > { %v2114_v27 = vperm.slane %v635_v24, %v2086_v54 }
 0x273   : > { %v654_v28 = vsel %vm581_vm5, %v653_v26, %v646_v25 }
 0x274   : > { %v2118_v29 = vperm.slane %v654_v28, %v2086_v54  ;;  %v640_v30 = vrot.slane %v2114_v27, 4  ;;  %v664_v31 = vshrl.u32 %v2114_v27, 16 }
 0x276   : > { %v663_v32 = vpack.i.b16 %v2118_v29, %v2114_v27  ;;  %v665_v33 = vshrl.u32 %v2118_v29, 16  ;;  %v2126_v34 = vsel %vm581_vm5, 0, %v640_v30  ;;  %v659_v35 = vrot.slane %v2118_v29, 4 }
 0x277   : > { %v670_v39 = vshrl.u32 %v2126_v34, 16 }
 0x278   : > { %v2129_v36 = vpack.i.b16 %v665_v33, %v664_v31  ;;  %v2132_v37 = vsel %vm581_vm5, 0, %v659_v35 }
 0x279   : > { %v669_v38 = vpack.i.b16 %v2132_v37, %v2126_v34  ;;  %v671_v40 = vshrl.u32 %v2132_v37, 16 }
 0x27b   : > { %v2138_v41 = vpack.i.b16 %v671_v40, %v670_v39 }
 0x29a   : > { %v680_v48 = vpop.permute.xlu2 %679 }
 0x29b   : > { %v691_v52 = vshrl.u32 %v680_v48, 16 }
 0x2b2   : > { %v798_v60 = vpop.permute.xlu2 %797 }
 0x2b3   : > { %v807_v9 = vshrl.u32 %v798_v60, 16 }
 0x2ba   : > { %v802_v25 = vpop.permute.xlu2 %801 }
 0x2ca   : > { %v676_v44 = vpop.permute.xlu0 %675 }
 0x2cb   : > { %v685_v45 = vshrl.u32 %v676_v44, 16  ;;  %v683_v47 = vpack.i.b16 %v676_v44, %v674_v43 }
 0x2cd   : > { %v686_v49 = vpack.i.b16 %v685_v45, %v684_v46  ;;  %v697_v50 = vperm.slane %v683_v47, %v2081_v42  ;;  %v813_v45 = vshrl.u32 %v802_v25, 16 }
 0x2cf   : > { %v723_v53 = vperm.slane %v686_v49, %v2081_v42  ;;  %v705_v57 = vrot.slane %v697_v50, 4 }
 0x2d1   : > { %v731_v61 = vrot.slane %v723_v53, 4 }
 0x2d2   : > { %v678_v51 = vpop.permute.xlu1 %677 }
 0x2d3   : > { %v689_v55 = vpack.i.b16 %v680_v48, %v678_v51  ;;  %v690_v56 = vshrl.u32 %v678_v51, 16 }
 0x2d5   : > { %v692_v58 = vpack.i.b16 %v691_v52, %v690_v56  ;;  %v702_v59 = vperm.slane %v689_v55, %v2081_v42 }
 0x2d7   : > { %v703_v62 = vrot.slane %v702_v59, 4  ;;  %v706_v63 = vsel %vm581_vm5, %v702_v59, %v705_v57  ;;  %v728_v0 = vperm.slane %v692_v58, %v2081_v42 }
 0x2d8   : > { %v714_v1 = vperm.slane %v706_v63, %v2086_v54 }
 0x2d9   : > { %v704_v2 = vsel %vm581_vm5, %v703_v62, %v697_v50  ;;  %v729_v3 = vrot.slane %v728_v0, 4  ;;  %v732_v4 = vsel %vm581_vm5, %v728_v0, %v731_v61 }
 0x2da   : > { %v710_v5 = vperm.slane %v704_v2, %v2086_v54  ;;  %v717_v6 = vrot.slane %v714_v1, 4  ;;  %v740_v7 = vperm.slane %v732_v4, %v2086_v54  ;;  %v796_v8 = vpop.permute.xlu1 %795 }
 0x2db   : > { %v730_v10 = vsel %vm581_vm5, %v729_v3, %v723_v53  ;;  %v806_v11 = vshrl.u32 %v796_v8, 16  ;;  %v805_v17 = vpack.i.b16 %v798_v60, %v796_v8 }
 0x2dc   : > { %v715_v12 = vrot.slane %v710_v5, 4  ;;  %v718_v13 = vsel %vm581_vm5, 0, %v717_v6  ;;  %v736_v14 = vperm.slane %v730_v10, %v2086_v54  ;;  %v743_v15 = vrot.slane %v740_v7, 4 }
 0x2dd   : > { %v750_v16 = vrot.slane %v718_v13, 4  ;;  %v808_v21 = vpack.i.b16 %v807_v9, %v806_v11  ;;  %v745_v23 = vsel %vm581_vm5, %v717_v6, %v710_v5  ;;  %v819_v30 = vperm.slane %v805_v17, %v2081_v42 }
 0x2de   : > { %v716_v18 = vsel %vm581_vm5, 0, %v715_v12  ;;  %v741_v19 = vrot.slane %v736_v14, 4  ;;  %v744_v20 = vsel %vm581_vm5, 0, %v743_v15  ;;  %v764_v31 = vsel %vm581_vm5, %v743_v15, %v736_v14 }
 0x2df   : > { %v769_v22 = vrot.slane %v744_v20, 4  ;;  %v751_v24 = vsel %vm581_vm5, %v750_v16, %v716_v18  ;;  %v845_v35 = vperm.slane %v808_v21, %v2081_v42  ;;  %v749_v40 = vperm.slane %v745_v23, %v2081_v42 }
 0x2e0   : > { %v742_v26 = vsel %vm581_vm5, 0, %v741_v19  ;;  %v755_v28 = vperm.slane %v751_v24, %v2081_v42  ;;  %v768_v49 = vperm.slane %v764_v31, %v2081_v42  ;;  %v827_v51 = vrot.slane %v819_v30, 4 }
 0x2e1   : > { %v770_v33 = vsel %vm581_vm5, %v769_v22, %v742_v26  ;;  %v853_v56 = vrot.slane %v845_v35, 4 }
 0x2e2   : > { %v800_v39 = vpop.permute.xlu1 %799  ;;  %v756_v43 = vrot.slane %v755_v28, 4  ;;  %v774_v44 = vperm.slane %v770_v33, %v2081_v42 }
 0x2e3   : > { %v811_v46 = vpack.i.b16 %v802_v25, %v800_v39  ;;  %v812_v47 = vshrl.u32 %v800_v39, 16 }
 0x2e4   : > { %v757_v48 = vsel %vm581_vm5, %v756_v43, %v749_v40  ;;  %v775_v50 = vrot.slane %v774_v44, 4 }
 0x2e5   : > { %v814_v52 = vpack.i.b16 %v813_v45, %v812_v47  ;;  %v824_v53 = vperm.slane %v811_v46, %v2081_v42  ;;  %v761_v55 = vperm.slane %v757_v48, %v2086_v54 }
 0x2e6   : > { %v776_v57 = vsel %vm581_vm5, %v775_v50, %v768_v49 }
 0x2e7   : > { %v825_v58 = vrot.slane %v824_v53, 4  ;;  %v828_v59 = vsel %vm581_vm5, %v824_v53, %v827_v51  ;;  %v850_v60 = vperm.slane %v814_v52, %v2081_v42  ;;  %v780_v61 = vperm.slane %v776_v57, %v2086_v54 }
 0x2e8   : > { %v836_v62 = vperm.slane %v828_v59, %v2086_v54  ;;  %v786_v63 = vshrl.u32 %v761_v55, 16  ;;  %v762_v0 = vrot.slane %v761_v55, 4 }
 0x2e9   : > { %v826_v1 = vsel %vm581_vm5, %v825_v58, %v819_v30  ;;  %v851_v2 = vrot.slane %v850_v60, 4  ;;  %v854_v3 = vsel %vm581_vm5, %v850_v60, %v853_v56  ;;  %v785_v4 = vpack.i.b16 %v780_v61, %v761_v55 }
 0x2ea   : > { %v832_v5 = vperm.slane %v826_v1, %v2086_v54  ;;  %v839_v6 = vrot.slane %v836_v62, 4  ;;  %v862_v7 = vperm.slane %v854_v3, %v2086_v54  ;;  %v787_v8 = vshrl.u32 %v780_v61, 16 }
 0x2eb   : > { %v852_v9 = vsel %vm581_vm5, %v851_v2, %v845_v35  ;;  %v931_v10 = vsel %vm926_vm6, %v785_v4, 0  ;;  %v763_v11 = vsel %vm581_vm5, 0, %v762_v0  ;;  %v781_v12 = vrot.slane %v780_v61, 4  ;;  %v918_v2 = vld [vmem:[#allocation7] sm:$0xff] }
 0x2ec   : > { %v837_v13 = vrot.slane %v832_v5, 4  ;;  %v840_v14 = vsel %vm581_vm5, 0, %v839_v6  ;;  %v858_v15 = vperm.slane %v852_v9, %v2086_v54  ;;  %v865_v16 = vrot.slane %v862_v7, 4  ;;  %940 = vmatpush.bf16.xpose.msra.mxu1 %v931_v10 }
 0x2ed   : > { %v872_v17 = vrot.slane %v840_v14, 4  ;;  %v788_v18 = vpack.i.b16 %v787_v8, %v786_v63  ;;  %v782_v19 = vsel %vm581_vm5, 0, %v781_v12  ;;  %v792_v26 = vshrl.u32 %v763_v11, 16 }
 0x2ee   : > { %v838_v20 = vsel %vm581_vm5, 0, %v837_v13  ;;  %v863_v21 = vrot.slane %v858_v15, 4  ;;  %v866_v22 = vsel %vm581_vm5, 0, %v865_v16  ;;  %v791_v23 = vpack.i.b16 %v782_v19, %v763_v11 }
 0x2ef   : > { %v891_v24 = vrot.slane %v866_v22, 4  ;;  %v950_v25 = vsel %vm926_vm6, %v788_v18, 0  ;;  %v793_v28 = vshrl.u32 %v782_v19, 16  ;;  %v867_v33 = vsel %vm581_vm5, %v839_v6, %v832_v5 }
 0x2f0   : > { %959 = vmatpush.bf16.xpose.msra.mxu2 %v950_v25  ;;  %v969_v30 = vsel %vm926_vm6, %v791_v23, 0  ;;  %v864_v31 = vsel %vm581_vm5, 0, %v863_v21  ;;  %v873_v35 = vsel %vm581_vm5, %v872_v17, %v838_v20  ;;  %v886_v43 = vsel %vm581_vm5, %v865_v16, %v858_v15 }
 0x2f1   : > { %978 = vmatpush.bf16.xpose.msra.mxu3 %v969_v30  ;;  %v794_v39 = vpack.i.b16 %v793_v28, %v792_v26  ;;  %v877_v40 = vperm.slane %v873_v35, %v2081_v42  ;;  %v892_v44 = vsel %vm581_vm5, %v891_v24, %v864_v31  ;;  %v871_v47 = vperm.slane %v867_v33, %v2081_v42 }
 0x2f2   : > { %v896_v45 = vperm.slane %v892_v44, %v2081_v42  ;;  %v890_v49 = vperm.slane %v886_v43, %v2081_v42  ;;  %v1847_v63 = vmov 0   ;;  %vm919_vm9 = vcmp.ne.s32.totalorder %v918_v2, 0 }
 0x2f3   : > { %v988_v46 = vsel %vm926_vm6, %v794_v39, 0  ;;  %1429 = vmatmul.msk.bf16.vlgmr.msra.gmra.mxu1 %vm926_vm6, %v663_v32  ;;  %v878_v48 = vrot.slane %v877_v40, 4  ;;  %v1848_v3 = vmov -1e+30  }
 0x2f4   : > { %997 = vmatpush.bf16.xpose.msrb.mxu0 %v988_v46  ;;  %v897_v50 = vrot.slane %v896_v45, 4 }
 0x2f5   : > { %v879_v51 = vsel %vm581_vm5, %v878_v48, %v871_v47 }
 0x2f6   : > { %v883_v52 = vperm.slane %v879_v51, %v2086_v54  ;;  %v898_v53 = vsel %vm581_vm5, %v897_v50, %v890_v49 }
 0x2f7   : > { %1430 = vmatmul.msk.bf16.vlgmr.msra.gmra.mxu2 %vm926_vm6, %v2129_v36  ;;  %v902_v27 = vperm.slane %v898_v53, %v2086_v54 }
 0x2f8   : > { %1431 = vmatmul.msk.bf16.vlgmr.msra.gmra.mxu3 %vm926_vm6, %v669_v38  ;;  %v884_v29 = vrot.slane %v883_v52, 4  ;;  %v908_v32 = vshrl.u32 %v883_v52, 16 }
 0x2f9   : > { %v907_v42 = vpack.i.b16 %v902_v27, %v883_v52  ;;  %v909_v55 = vshrl.u32 %v902_v27, 16  ;;  %v903_v56 = vrot.slane %v902_v27, 4  ;;  %v1132_v27 = vld [vmem:[#allocation10] sm:$0xf] }
 0x2fa   : > { %v885_v57 = vsel %vm581_vm5, 0, %v884_v29  ;;  %v1172_v29 = vld [vmem:[#allocation10 + $0x8] sm:$0xf] }
 0x2fb   : > { %1432 = vmatmul.msk.bf16.vlgmr.msrb.gmra.mxu0 %vm926_vm6, %v2138_v41  ;;  %v1048_v36 = vsel %vm1046_vm7, %v907_v42, 0  ;;  %v910_v54 = vpack.i.b16 %v909_v55, %v908_v32  ;;  %v904_v58 = vsel %vm581_vm5, 0, %v903_v56  ;;  %v914_v37 = vshrl.u32 %v885_v57, 16  ;;  %v917_v41 = vld [vmem:[%s408_s28] sm:$0x1]  ;;  %s1254_s28 = sshll.u32 %s1250_s16, 4  ;;  %s1255_s28 = int_to_ptr.hbm [resolvable:$true] %s1254_s28 }
 0x2fc   : > { %1057 = vmatpush.bf16.msrb.mxu1 %v1048_v36  ;;  %v913_v34 = vpack.i.b16 %v904_v58, %v885_v57  ;;  %v915_v38 = vshrl.u32 %v904_v58, 16  ;;  %vm920_vm8 = vcmp.ne.s32.totalorder %v917_v41, 0  ;;  %v1157_v42 = vsel %vm1046_vm7, %v1132_v27, 0  ;;  %v1133_v55 = vld [vmem:[#allocation10 + $0x4] sm:$0xf]  ;;  %s1736_s2 = sshra.s32 %s1255_s28, 4  ;;  %s1737_s2 = int_to_ptr.hbm [resolvable:$true] %s1736_s2 }
 0x2fd   : > { %v1067_v59 = vsel %vm1046_vm7, %v910_v54, 0  ;;  %v921_v0 = vsel %vm920_vm8, 1, %v1847_v63  ;;  %v1177_v32 = vsel %vm1046_vm7, %v1172_v29, 0  ;;  %v1193_v56 = vld [vmem:[#allocation10 + $0xc] sm:$0xf]  ;;  %v1138_v57 = vsel %vm1046_vm7, %v1133_v55, 0  ;;  %p1743_p2 = scmp.lt.s32.totalorder %s1737_s2, %s2306_s10 }
 0x2fe   : > { %1076 = vmatpush.bf16.msrb.mxu2 %v1067_v59  ;;  %v1086_v60 = vsel %vm1046_vm7, %v913_v34, 0  ;;  %v916_v61 = vpack.i.b16 %v915_v38, %v914_v37  ;;  %v922_v1 = vperm.slane %v921_v0, 0  ;;  %v1198_v36 = vsel %vm1046_vm7, %v1193_v56, 0  ;;  %s1738_s26 = scalar_lea.hbm %s1737_s2, 8 }
 0x2ff   : > { %1095 = vmatpush.bf16.msrb.mxu3 %v1086_v60  ;;  %p1739_p1 = scmp.ne.s32.totalorder %s1737_s2, %s1738_s26  ;;  %p1744_p11 = scmp.lt.s32.totalorder %s1742_s17, %s1738_s26 }
 0x300   : > { %v1105_v62 = vsel %vm1046_vm7, %v916_v61, 0  ;;  %vm923_vm10 = vcmp.eq.s32.totalorder %v922_v1, 1  ;;  %1147 = vmatpush.bf16.msra.mxu1 %v1138_v57 }
 0x301   : > { %1114 = vmatpush.bf16.msra.mxu0 %v1105_v62  ;;  %vm924_vm11 = vmand %vm919_vm9, %vm923_vm10  ;;  %p1740_p4 = pnand %p1739_p1, %p1987_p7  ;;  %p1745_p10 = por %p1744_p11, %p1743_p2 }
 0x302   : > { %v925_v4 = vsel %vm924_vm11, 0.0, %v1848_v3  ;;  %1166 = vmatpush.bf16.msra.mxu2 %v1157_v42 }
 0x303   : > { %1186 = vmatpush.bf16.msra.mxu3 %v1177_v32  ;;  %p1741_p8 = pneg %p1740_p4 }
 0x305   : > { %1207 = vmatpush.bf16.msrb.mxu0 %v1198_v36  ;;  %p1746_p12 = pnand %p1745_p10, %p1741_p8 }
 0x370   : > { %v942_v5 = vpop.f32.mrf.mxu1 }
 0x371   : > { %v943_v6 = vadd.f32 %v942_v5, %v925_v4 }
 0x373   : > { %v1003_v7 = vsel %vm926_vm6, %v943_v6, -inf }
 0x374   : > { %1004 = vmax.xlane.f32.xlu1 %v1003_v7 }
 0x378   : > { %v999_v8 = vpop.f32.mrf.mxu0  ;;  %v944_v9 = vpop.f32.mrf.mxu1 }
 0x379   : > { %v1000_v17 = vadd.f32 %v999_v8, %v925_v4 }
 0x37a   : > { %v961_v10 = vpop.f32.mrf.mxu2 }
 0x37b   : > { %v962_v11 = vadd.f32 %v961_v10, %v925_v4  ;;  %v980_v12 = vpop.f32.mrf.mxu3  ;;  %v1012_v20 = vsel %vm926_vm6, %v1000_v17, -inf }
 0x37c   : > { %v981_v13 = vadd.f32 %v980_v12, %v925_v4 }
 0x37d   : > { %v1006_v14 = vsel %vm926_vm6, %v962_v11, -inf }
 0x37e   : > { %1007 = vmax.xlane.f32.xlu2 %v1006_v14  ;;  %v1009_v15 = vsel %vm926_vm6, %v981_v13, -inf }
 0x37f   : > { %1010 = vmax.xlane.f32.xlu0 %v1009_v15 }
 0x380   : > { %v1001_v16 = vpop.f32.mrf.mxu0 }
 0x382   : > { %v963_v18 = vpop.f32.mrf.mxu2 }
 0x383   : > { %v982_v19 = vpop.f32.mrf.mxu3 }
 0x387   : > { %1013 = vmax.xlane.f32.xlu0 %v1012_v20 }
 0x3e7   : > { %v1005_v21 = vpop.xlane.xlu1 %1004 }
 0x3e8   : > { %v1015_v22 = vsub.f32 %v943_v6, %v1005_v21 }
 0x3ea   : > { %v1019_v23 = vmul.f32 1.442695, %v1015_v22 }
 0x3ec   : > { %1556 = vpow2.f32 %v1019_v23 }
 0x3f1   : > { %v1008_v24 = vpop.xlane.xlu2 %1007 }
 0x3f2   : > { %v1557_v25 = vpop.eup %1556  ;;  %v1016_v26 = vsub.f32 %v962_v11, %v1008_v24  ;;  %v1011_v28 = vpop.xlane.xlu0 %1010 }
 0x3f3   : > { %v1017_v30 = vsub.f32 %v981_v13, %v1011_v28  ;;  %v1027_v31 = vsel %vm926_vm6, %v1557_v25, 0.0  ;;  %v1039_v33 = vpack.c.bf16 %v1557_v25, %v1557_v25 }
 0x3f4   : > { %v1021_v35 = vmul.f32 1.442695, %v1016_v26  ;;  %1028 = vadd.xlane.f32.xlu2 %v1027_v31 }
 0x3f5   : > { %v1023_v39 = vmul.f32 1.442695, %v1017_v30  ;;  %1433 = vmatmul.msk.bf16.vlgmr.msrb.gmra.mxu1 %vm926_vm6, %v1039_v33 }
 0x3f6   : > { %1558 = vpow2.f32 %v1021_v35 }
 0x3f7   : > { %1560 = vpow2.f32 %v1023_v39 }
 0x3fa   : > { %v1014_v40 = vpop.xlane.xlu0 %1013 }
 0x3fb   : > { %v1018_v43 = vsub.f32 %v1000_v17, %v1014_v40 }
 0x3fc   : > { %v1559_v44 = vpop.eup %1558 }
 0x3fd   : > { %v1561_v45 = vpop.eup %1560  ;;  %v1025_v46 = vmul.f32 1.442695, %v1018_v43  ;;  %v1030_v47 = vsel %vm926_vm6, %v1559_v44, 0.0  ;;  %v1040_v48 = vpack.c.bf16 %v1559_v44, %v1559_v44 }
 0x3fe   : > { %1031 = vadd.xlane.f32.xlu0 %v1030_v47  ;;  %v1033_v49 = vsel %vm926_vm6, %v1561_v45, 0.0  ;;  %v1041_v50 = vpack.c.bf16 %v1561_v45, %v1561_v45 }
 0x3ff   : > { %1562 = vpow2.f32 %v1025_v46  ;;  %1434 = vmatmul.msk.bf16.vlgmr.msrb.gmra.mxu2 %vm926_vm6, %v1040_v48  ;;  %1034 = vadd.xlane.f32.xlu1 %v1033_v49 }
 0x400   : > { %1435 = vmatmul.msk.bf16.vlgmr.msrb.gmra.mxu3 %vm926_vm6, %v1041_v50 }
 0x405   : > { %v1563_v51 = vpop.eup %1562 }
 0x406   : > { %v1042_v52 = vpack.c.bf16 %v1563_v51, %v1563_v51  ;;  %v1036_v53 = vsel %vm926_vm6, %v1563_v51, 0.0 }
 0x407   : > { %1037 = vadd.xlane.f32.xlu2 %v1036_v53 }
 0x408   : > { %1436 = vmatmul.msk.bf16.vlgmr.msra.gmra.mxu0 %vm926_vm6, %v1042_v52 }
 0x467   : > { %v1029_v54 = vpop.xlane.xlu2 %1028 }
 0x468   : > { %1564 = vrcp.f32 %v1029_v54 }
 0x46e   : > { %v1565_v58 = vpop.eup %1564 }
 0x471   : > { %v1032_v59 = vpop.xlane.xlu0 %1031 }
 0x472   : > { %v1059_v34 = vpop.f32.mrf.mxu1  ;;  %v1035_v60 = vpop.xlane.xlu1 %1034  ;;  %1566 = vrcp.f32 %v1032_v59 }
 0x473   : > { %v1124_v37 = vmul.f32 %v1565_v58, %v1059_v34  ;;  %1568 = vrcp.f32 %v1035_v60 }
 0x475   : > { %v1128_v38 = vpack.c.bf16 %v1124_v37, %v1124_v37 }
 0x477   : > { %1438 = vmatmul.msk.bf16.vlgmr.msra.gmra.mxu2 %vm926_vm6, %v1128_v38 }
 0x478   : > { %v1567_v41 = vpop.eup %1566 }
 0x479   : > { %v1569_v0 = vpop.eup %1568 }
 0x47a   : > { %v1061_v61 = vpop.f32.mrf.mxu1  ;;  %v1038_v62 = vpop.xlane.xlu2 %1037 }
 0x47b   : > { %1570 = vrcp.f32 %v1038_v62 }
 0x481   : > { %v1571_v4 = vpop.eup %1570 }
 0x482   : > { %v1078_v63 = vpop.f32.mrf.mxu2 }
 0x483   : > { %v1125_v1 = vmul.f32 %v1567_v41, %v1078_v63  ;;  %v1097_v2 = vpop.f32.mrf.mxu3 }
 0x484   : > { %v1126_v3 = vmul.f32 %v1569_v0, %v1097_v2 }
 0x485   : > { %v1129_v5 = vpack.c.bf16 %v1125_v1, %v1125_v1  ;;  %v1116_v6 = vpop.f32.mrf.mxu0 }
 0x486   : > { %v1130_v7 = vpack.c.bf16 %v1126_v3, %v1126_v3  ;;  %v1127_v8 = vmul.f32 %v1571_v4, %v1116_v6 }
 0x487   : > { %1437 = vmatmul.msk.bf16.vlgmr.msra.gmra.mxu1 %vm926_vm6, %v1129_v5 }
 0x488   : > { %v1131_v9 = vpack.c.bf16 %v1127_v8, %v1127_v8  ;;  %1439 = vmatmul.msk.bf16.vlgmr.msra.gmra.mxu3 %vm926_vm6, %v1130_v7 }
 0x48a   : > { %v1080_v10 = vpop.f32.mrf.mxu2  ;;  %1440 = vmatmul.msk.bf16.vlgmr.msrb.gmra.mxu0 %vm926_vm6, %v1131_v9 }
 0x48b   : > { %v1099_v11 = vpop.f32.mrf.mxu3 }
 0x48d   : > { %v1118_v12 = vpop.f32.mrf.mxu0 }
 0x48e   : > { %1749 = shalt.err (!%p1746_p12)
}
 0x48f   : > { %1466 = dma.vmem_to_hbm [thread:$0]  (%p1987_p7), %s1253_s24, 128, %s1255_s28, %s1226_s19   ;;  %v1551_v20 = vld [vmem:[%s2304_s8] ss:$0 sm:$0xff] }
 0x490   : > { %s1236_s22 = scalar_lea.hbm %s2305_s9, %s1443_s23  ;;  %s462_s30 = scalar_lea.vmem [#allocation11], %s2042_s15 }
 0x491   : > { %s1238_s13 = sshll.u32 %s462_s30, 4  ;;  %s1240_s16 = sshll.u32 %s1236_s22, 4  ;;  %s1239_s13 = int_to_ptr.vmem [resolvable:$true] %s1238_s13  ;;  %s1241_s16 = int_to_ptr.hbm [resolvable:$true] %s1240_s16 }
 0x492   : > { %s1221_s23 = scalar_lea.sflag [#allocation4], %s2039_s5  ;;  %s1764_s24 = sshra.s32 %s1241_s16, 4  ;;  %s1765_s24 = int_to_ptr.hbm [resolvable:$true] %s1764_s24 }
 0x493   : > { %s1766_s28 = scalar_lea.hbm %s1765_s24, 8  ;;  %s1770_s2 = scalar_lea.hbm %s2305_s9, 16 }
 0x494   : > { %p1767_p13 = scmp.ne.s32.totalorder %s1765_s24, %s1766_s28  ;;  %p1771_p3 = scmp.lt.s32.totalorder %s1765_s24, %s2305_s9 }
 0x495   : > { %p1772_p5 = scmp.lt.s32.totalorder %s1770_s2, %s1766_s28 }
 0x496   : > { %p1768_p9 = pnand %p1767_p13, %p1987_p7 }
 0x497   : > { %p1773_p1 = por %p1772_p5, %p1771_p3 }
 0x498   : > { %p1769_p0 = pneg %p1768_p9 }
 0x49a   : > { %p1774_p4 = pnand %p1773_p1, %p1769_p0 }
 0x4fa   : > { %v1168_v13 = vpop.f32.mrf.mxu2 }
 0x502   : > { %v1170_v14 = vpop.f32.mrf.mxu2 }
 0x504   : > { %v1149_v15 = vpop.f32.mrf.mxu1 }
 0x505   : > { %v1169_v17 = vadd.f32 %v1168_v13, %v1149_v15 }
 0x507   : > { %v1209_v16 = vpop.f32.mrf.mxu0 }
 0x50b   : > { %v1188_v18 = vpop.f32.mrf.mxu3 }
 0x50c   : > { %v1192_v19 = vadd.f32 %v1188_v18, %v1169_v17  ;;  %v1151_v21 = vpop.f32.mrf.mxu1 }
 0x50e   : > { %v1213_v22 = vadd.f32 %v1209_v16, %v1192_v19 }
 0x50f   : > { %v1211_v23 = vpop.f32.mrf.mxu0 }
 0x510   : > { %v1218_v24 = vadd.f32 %v1551_v20, %v1213_v22 }
 0x512   : > { %1219 = vst.msk [vmem:[%s462_s30] sm:$0xff] %vm472_vm0, %v1218_v24 }
 0x513   : > { %v1190_v25 = vpop.f32.mrf.mxu3 }
 0x514   : > { %1777 = shalt.err (!%p1774_p4)
}
 0x515   : > { %1465 = dma.vmem_to_hbm [thread:$0]  (%p1987_p7), %s1239_s13, 128, %s1241_s16, %s1221_s23  }
 0x516 PF: > { %s2331_s5 = sld [smem:[#allocation20_spill]] }
 0x517   : > { %s2333_s17 = sld [smem:[#allocation22_spill]] }
 0x51c   : > { %s1266_s21 = sand.u32 1, %s2331_s5  }
 0x51d   : > { %p2334_p8 = scmp.ge.s32.totalorder %s2333_s17, 2  ;;  %s1267_s25 = scalar_lea.sflag [#allocation4], %s1266_s21 }
 0x51f   : > { %p1487_p2 = pnand %p2334_p8, %p1939_p6 }
 0x521   : > { %p1488_p11 = pneg %p1487_p2 }
 0x523   : > { %1811 = dma.done.wait (%p1488_p11), %s1267_s25, 128  }
 0x524   : > { %1813 = vsyncadd (%p1488_p11), %s1267_s25, 4294967168  ;;  %s1277_s7 = scalar_lea.sflag [#allocation13], %s1266_s21 }
 0x525   : > { %1815 = dma.done.wait (%p1488_p11), %s1277_s7, 128  }
 0x526   : > { %1817 = vsyncadd (%p1488_p11), %s1277_s7, 4294967168  ;;  %s2335_s16 = sld [smem:[#allocation24_spill]]  ;;  %s2338_s13 = smov %s1824_s14 }
 0x527   : > { %s2336_s20 = sld [smem:[#allocation21_spill]] }
 0x528   : > { %s2337_s15 = sld [smem:[#allocation25_spill]] }
 0x52c   : > { %p31_p7 = scmp.ge.s32.totalorder %s2335_s16, 4  }
 0x52d   : > { %s2339_s14 = smov %s2336_s20 }
 0x52e   :  { %33 = sbr.rel (!%p31_p7) target bundleno = 14 (0xe), region = 143 }
 0x533   :  { %1283 = vsyncpa [#allocation3], 1 }
 0x534   :  { %1285 = vsyncpa [#allocation3 + $0x1], 1 }
 0x535   :  { %1286 = vsyncpa [#allocation6], 1 }
 0x536   :  { %1288 = vsyncpa [#allocation6 + $0x1], 1 }
 0x537   :  { %1289 = vsyncpa [#allocation9], 1 }
 0x538   :  { %1290 = vsyncpa [#allocation4], 1 }
 0x539   :  { %1292 = vsyncpa [#allocation4 + $0x1], 1 }
 0x53a   :  { %1293 = vsyncpa [#allocation13], 1 }
 0x53b   :  { %1295 = vsyncpa [#allocation13 + $0x1], 1 }

</bundles_post_ra>
